<compile_context>
chip_gen: v7x
topology: tpu7x:2x2x1
jax: 0.10.0
libtpu: 0.0.40
codegen_flags: <defaults>
</compile_context>

<pallas_src>
import math

import jax
import jax.numpy as jnp
from jax.experimental import pallas as pl
from jax.experimental.pallas import tpu as pltpu


_LANE = 128
_BLOCK_BYTES_TARGET = 2 * 1024 * 1024   # ~2 MiB of x per block
_MAX_TILE_COLS = 2048                   # feature tile when cols is huge (VMEM budget)


def _dyt_kernel(alpha_ref, x_ref, w_ref, b_ref, o_ref):
    # alpha_ref: SMEM (1,) scalar
    # x_ref/o_ref: VMEM (tile_rows, tile_cols)
    # w_ref/b_ref: VMEM (1, tile_cols) or (tile_rows, 1) -> jnp broadcasting
    alpha = alpha_ref[0]
    o_ref[...] = jnp.tanh(alpha * x_ref[...]) * w_ref[...] + b_ref[...]


def _round_up(v, m):
    return ((v + m - 1) // m) * m


def _sublane_multiple(dtype):
    itemsize = jnp.dtype(dtype).itemsize
    return max(8, 32 // itemsize)   # 8 for f32, 16 for bf16, 32 for int8


def _dyt_apply_2d(x2d, alpha, w2d, b2d, *, weight_per_row):
    """y = tanh(alpha*x)*w + b on a (rows, cols) slab.

    weight_per_row=False: w2d/b2d shape (1, cols)  -> broadcast over rows
    weight_per_row=True:  w2d/b2d shape (rows, 1)  -> broadcast over cols (lanes)
    """
    rows, cols = x2d.shape
    itemsize = jnp.dtype(x2d.dtype).itemsize
    sub = _sublane_multiple(x2d.dtype)

    # Column (lane) tiling: use the full width unless it is a very wide multiple
    # of 128 (keeps per-block VMEM bounded on v7x's 64 MiB).
    if cols % _LANE == 0 and cols > _MAX_TILE_COLS:
        tile_cols = _MAX_TILE_COLS
    else:
        tile_cols = cols

    # Row (sublane) tiling: ~2 MiB blocks, but keep >= 2 row steps when the
    # input is big enough so the parallel grid can shard across 2 TCs (v7x).
    rows_by_budget = max(sub, (_BLOCK_BYTES_TARGET // (tile_cols * itemsize)) // sub * sub)
    half_rows = _round_up(max(1, pl.cdiv(rows, 2)), sub)
    tile_rows = max(sub, min(rows_by_budget, half_rows))
    if tile_rows >= rows:
        tile_rows = rows            # full-dim block: always a legal block shape

    grid = (pl.cdiv(rows, tile_rows), pl.cdiv(cols, tile_cols))

    if weight_per_row:
        wb_block = (tile_rows, 1)
        wb_map = lambda i, j: (i, 0)
    else:
        wb_block = (1, tile_cols)
        wb_map = lambda i, j: (0, j)

    return pl.pallas_call(
        _dyt_kernel,
        out_shape=jax.ShapeDtypeStruct((rows, cols), x2d.dtype),
        grid_spec=pltpu.PrefetchScalarGridSpec(
            num_scalar_prefetch=0,
            grid=grid,
            in_specs=[
                pl.BlockSpec(memory_space=pltpu.SMEM),                      # alpha
                pl.BlockSpec((tile_rows, tile_cols), lambda i, j: (i, j)),  # x
                pl.BlockSpec(wb_block, wb_map),                             # weight
                pl.BlockSpec(wb_block, wb_map),                             # bias
            ],
            out_specs=pl.BlockSpec((tile_rows, tile_cols), lambda i, j: (i, j)),
        ),
        compiler_params=pltpu.CompilerParams(
            dimension_semantics=("parallel", "parallel"),
            vmem_limit_bytes=32 * 1024 * 1024,
        ),
    )(alpha, x2d, w2d, b2d)


def dyt_forward(x, alpha, weight, bias):
    """DyT forward matching the PyTorch module (4D NCHW channel-broadcast,
    otherwise last-dim broadcast)."""
    dtype = x.dtype
    alpha = jnp.asarray(alpha, dtype).reshape(1)
    weight = jnp.asarray(weight, dtype)
    bias = jnp.asarray(bias, dtype)

    if x.ndim == 4:
        # Native NCHW: free reshape to (N*C, H*W); per-(n,c) scalar params
        # become a tiny (N*C, 1) column broadcast over the H*W lane axis.
        n, c, h, w = x.shape
        x2d = x.reshape(n * c, h * w)
        w_col = jnp.tile(weight, n).reshape(n * c, 1)
        b_col = jnp.tile(bias, n).reshape(n * c, 1)
        y2d = _dyt_apply_2d(x2d, alpha, w_col, b_col, weight_per_row=True)
        return y2d.reshape(n, c, h, w)

    # Non-4D: weight/bias broadcast along the last (feature) dim.
    orig_shape = x.shape
    f = orig_shape[-1]
    rows = 1
    for d in orig_shape[:-1]:
        rows *= d
    x2d = x.reshape(rows, f)

    if f % _LANE != 0:
        # Lane-dense packing: fold g rows into the lane axis so the output's
        # last dim is a multiple of 128 (free reshape; weight pattern repeats).
        g = _LANE // math.gcd(f, _LANE)
        if g > 1 and rows % g == 0:
            x_packed = x2d.reshape(rows // g, g * f)
            w_packed = jnp.tile(weight, g).reshape(1, g * f)
            b_packed = jnp.tile(bias, g).reshape(1, g * f)
            y = _dyt_apply_2d(x_packed, alpha, w_packed, b_packed,
                              weight_per_row=False)
            return y.reshape(orig_shape)

    y = _dyt_apply_2d(x2d, alpha, weight.reshape(1, f), bias.reshape(1, f),
                      weight_per_row=False)
    return y.reshape(orig_shape)


def dyt_reference(x, alpha, weight, bias):
    t = jnp.tanh(jnp.asarray(alpha, x.dtype) * x)
    if x.ndim == 4:
        w = weight.reshape(1, -1, 1, 1)
        b = bias.reshape(1, -1, 1, 1)
    else:
        w = weight
        b = bias
    return t * w.astype(x.dtype) + b.astype(x.dtype)


if __name__ == "__main__":
    key = jax.random.PRNGKey(0)
    k1, k2, k3, k4, k5, k6 = jax.random.split(key, 6)

    # --- 2D case (FC resnet path): (batch, num_features), packed lane-dense ---
    num_features = 32
    batch = 16
    x2d = jax.random.normal(k1, (batch, num_features), dtype=jnp.float32)
    alpha = jnp.ones((1,), jnp.float32) * 0.5
    weight = jnp.ones((num_features,), jnp.float32) + 0.1 * jax.random.normal(
        k2, (num_features,), dtype=jnp.float32)
    bias = 0.1 * jax.random.normal(k3, (num_features,), dtype=jnp.float32)

    y2d = jax.block_until_ready(dyt_forward(x2d, alpha, weight, bias))
    ref2d = dyt_reference(x2d, alpha, weight, bias)
    assert jnp.allclose(y2d, ref2d, atol=1e-5, rtol=1e-5), "2D mismatch"

    # --- 4D case (NCHW): (batch, channels, H, W), native NCHW path ---
    c4 = 4
    x4d = jax.random.normal(k4, (2, c4, 16, 16), dtype=jnp.float32)
    w4 = jnp.ones((c4,), jnp.float32) + 0.1 * jax.random.normal(
        k5, (c4,), dtype=jnp.float32)
    b4 = jnp.linspace(-0.2, 0.2, c4, dtype=jnp.float32)

    y4d = jax.block_until_ready(dyt_forward(x4d, alpha, w4, b4))
    ref4d = dyt_reference(x4d, alpha, w4, b4)
    assert jnp.allclose(y4d, ref4d, atol=1e-5, rtol=1e-5), "4D mismatch"

    # --- 2D fallback path (rows not divisible by packing group, ragged tiles) ---
    x2d_b = jax.random.normal(k6, (37, num_features), dtype=jnp.float32)
    y2d_b = jax.block_until_ready(dyt_forward(x2d_b, alpha, weight, bias))
    ref2d_b = dyt_reference(x2d_b, alpha, weight, bias)
    assert jnp.allclose(y2d_b, ref2d_b, atol=1e-5, rtol=1e-5), "2D fallback mismatch"

    print("KERNEL_OK")
</pallas_src>

<mosaic_0001>
module attributes {stable_mosaic.version = 11 : i64} {
  func.func @_dyt_kernel(%arg0: i32, %arg1: i32, %arg2: memref<1xf32, #tpu.memory_space<smem>>, %arg3: memref<4x128xf32, #tpu.memory_space<vmem>>, %arg4: memref<1x128xf32, #tpu.memory_space<vmem>>, %arg5: memref<1x128xf32, #tpu.memory_space<vmem>>, %arg6: memref<4x128xf32, #tpu.memory_space<vmem>>) attributes {dimension_semantics = [#tpu.dimension_semantics<parallel>, #tpu.dimension_semantics<parallel>], iteration_bounds = array<i64: 1, 1>, scalar_prefetch = 0 : i64, scratch_operands = 0 : i64, tpu.core_type = #tpu.core_type<tc>, window_params = [{transform_indices = @transform_0, window_bounds = array<i64: 1>}, {transform_indices = @transform_1, window_bounds = array<i64: 4, 128>}, {transform_indices = @transform_2, window_bounds = array<i64: 1, 128>}, {transform_indices = @transform_3, window_bounds = array<i64: 1, 128>}, {transform_indices = @transform_4, window_bounds = array<i64: 4, 128>}]} {
    %c0 = arith.constant 0 : index
    %0 = memref.load %arg2[%c0] : memref<1xf32, #tpu.memory_space<smem>>
    %c0_0 = arith.constant 0 : index
    %c0_1 = arith.constant 0 : index
    %1 = vector.load %arg3[%c0_0, %c0_1] : memref<4x128xf32, #tpu.memory_space<vmem>>, vector<4x128xf32>
    %2 = vector.broadcast %0 : f32 to vector<4x128xf32>
    %3 = arith.mulf %2, %1 : vector<4x128xf32>
    %4 = math.tanh %3 : vector<4x128xf32>
    %c0_2 = arith.constant 0 : index
    %c0_3 = arith.constant 0 : index
    %5 = vector.load %arg4[%c0_2, %c0_3] : memref<1x128xf32, #tpu.memory_space<vmem>>, vector<1x128xf32>
    %6 = vector.broadcast %5 : vector<1x128xf32> to vector<4x128xf32>
    %7 = arith.mulf %4, %6 : vector<4x128xf32>
    %c0_4 = arith.constant 0 : index
    %c0_5 = arith.constant 0 : index
    %8 = vector.load %arg5[%c0_4, %c0_5] : memref<1x128xf32, #tpu.memory_space<vmem>>, vector<1x128xf32>
    %9 = vector.broadcast %8 : vector<1x128xf32> to vector<4x128xf32>
    %10 = arith.addf %7, %9 : vector<4x128xf32>
    %c0_6 = arith.constant 0 : index
    %c0_7 = arith.constant 0 : index
    %11 = vector.load %arg6[%c0_6, %c0_7] : memref<4x128xf32, #tpu.memory_space<vmem>>, vector<4x128xf32>
    tpu.vector_store %arg6[%c0_6, %c0_7], %10 {strides = array<i32>} : memref<4x128xf32, #tpu.memory_space<vmem>>, vector<4x128xf32>,
    return
  }
  func.func @transform_0(%arg0: i32, %arg1: i32) -> i32 {
    %c0_i32 = arith.constant 0 : i32
    %c0_i32_0 = arith.constant 0 : i32
    return %c0_i32 : i32
  }
  func.func @transform_1(%arg0: i32, %arg1: i32) -> (i32, i32) {
    %c0_i32 = arith.constant 0 : i32
    return %arg0, %arg1 : i32, i32
  }
  func.func @transform_2(%arg0: i32, %arg1: i32) -> (i32, i32) {
    %c0_i32 = arith.constant 0 : i32
    %c0_i32_0 = arith.constant 0 : i32
    return %c0_i32, %arg1 : i32, i32
  }
  func.func @transform_3(%arg0: i32, %arg1: i32) -> (i32, i32) {
    %c0_i32 = arith.constant 0 : i32
    %c0_i32_0 = arith.constant 0 : i32
    return %c0_i32, %arg1 : i32, i32
  }
  func.func @transform_4(%arg0: i32, %arg1: i32) -> (i32, i32) {
    %c0_i32 = arith.constant 0 : i32
    return %arg0, %arg1 : i32, i32
  }
}

</mosaic_0001>

<bundles_post_ra>
// kernel: tpu_custom_call.1
= control target key start
LH: loop header
LB: loop body
LE: loop exit
PB: predicated region body
PF: predicated region fallthrough
CT: control target
= control target key end

     0   :  { %10 = vsyncpa [#allocation4], 0  ;;  %s182_s0 = inlined_call_operand.<no memory space> [shape: f32[1], index: 0, kind: input, shape index: {}]   ;;  %s183_s1 = inlined_call_operand.hbm [shape: f32[4,128], index: 1, kind: input, shape index: {}]   ;;  %s184_s2 = inlined_call_operand.vmem [shape: f32[1,128], index: 2, kind: input, shape index: {}]   ;;  %s185_s3 = inlined_call_operand.vmem [shape: f32[1,128], index: 3, kind: input, shape index: {}]   ;;  %s186_s4 = inlined_call_operand.hbm [shape: f32[4,128], index: 4, kind: output, shape index: {}]  }
   0x1   :  { %11 = vsyncpa [#allocation5], 0  ;;  %s122_s15 = smov [#allocation3]   ;;  %s74_s19 = scalar_lea.hbm %s183_s1, 64 }
   0x2   :  { %s20_s16 = sshll.u32 %s122_s15, 4  ;;  %p75_p0 = scmp.ne.s32.totalorder %s183_s1, %s74_s19  ;;  %s21_s16 = int_to_ptr.vmem [resolvable:$true] %s20_s16 }
   0x3   :  { %p78_p1 = scmp.lt.u32.totalorder %s74_s19, %s183_s1 }
   0x5   :  { %p80_p2 = pnand %p78_p1, %p75_p0 }
   0x7   :  { %83 = shalt.err (!%p80_p2)
}
   0x8   :  { %s84_s24 = scalar_lea.vmem %s21_s16, 64  ;;  %p89_p4 = scmp.lt.s32.totalorder %s21_s16, %s21_s16 }
   0x9   :  { %p85_p3 = scmp.ne.s32.totalorder %s21_s16, %s84_s24  ;;  %p90_p5 = scmp.lt.s32.totalorder %s84_s24, %s84_s24 }
   0xb   :  { %p91_p6 = por %p90_p5, %p89_p4 }
   0xd   :  { %p92_p7 = pnand %p91_p6, %p85_p3 }
   0xf   :  { %95 = shalt.err (!%p92_p7)
}
  0x10   :  { %23 = dma.hbm_to_vmem [thread:$0]  %s183_s1, 64, %s21_s16, [#allocation4]  }
  0x11   :  { %118 = dma.done.wait [#allocation4], 64  }
  0x12   :  { %119 = vsyncadd [#allocation4], 4294967232  ;;  %v33_v0 = vstv %s182_s0  ;;  %v32_v1 = vld [vmem:[#allocation3] sm:$0xf]  ;;  %s123_s7 = smov [#allocation6]  }
  0x13   :  { %v34_v2 = vmul.f32 %v33_v0, %v32_v1  ;;  %v68_v3 = vld [vmem:[%s184_s2] ss:$0 sm:$0xff]  ;;  %s59_s1 = sshll.u32 %s123_s7, 4  ;;  %s60_s1 = int_to_ptr.vmem [resolvable:$true] %s59_s1 }
  0x14   :  { %v69_v5 = vld [vmem:[%s185_s3] ss:$0 sm:$0xff]  ;;  %s96_s8 = scalar_lea.vmem %s60_s1, 64  ;;  %p101_p9 = scmp.lt.s32.totalorder %s60_s1, %s60_s1 }
  0x15   :  { %72 = vtanh.f32 %v34_v2  ;;  %p97_p8 = scmp.ne.s32.totalorder %s60_s1, %s96_s8  ;;  %p102_p10 = scmp.lt.s32.totalorder %s96_s8, %s96_s8 }
  0x17   :  { %p103_p11 = por %p102_p10, %p101_p9 }
  0x19   :  { %p104_p12 = pnand %p103_p11, %p97_p8 }
  0x1f   :  { %v73_v4 = vpop.eup %72 }
  0x20   :  { %v43_v6 = vmul.f32 %v73_v4, %v68_v3 }
  0x22   :  { %v51_v7 = vadd.f32 %v69_v5, %v43_v6 }
  0x24   :  { %52 = vst [vmem:[#allocation6] sm:$0xf] %v51_v7 }
  0x25   :  { %107 = shalt.err (!%p104_p12)
}
  0x26   :  { %s108_s9 = scalar_lea.hbm %s186_s4, 64 }
  0x27   :  { %p109_p13 = scmp.ne.s32.totalorder %s186_s4, %s108_s9  ;;  %p112_p0 = scmp.lt.u32.totalorder %s108_s9, %s186_s4 }
  0x29   :  { %p114_p1 = pnand %p112_p0, %p109_p13 }
  0x2b   :  { %117 = shalt.err (!%p114_p1)
}
  0x2c   :  { %62 = dma.vmem_to_hbm [thread:$0]  %s60_s1, 64, %s186_s4, [#allocation5]  }
  0x2d   :  { %120 = dma.done.wait [#allocation5], 64  }
  0x2e   :  { %121 = vsyncadd [#allocation5], 4294967232 }
  0x2f   :  { %66 = vsyncpa [#allocation4], 1 }
  0x30   :  { %67 = vsyncpa [#allocation5], 1 }

</bundles_post_ra>
